<compile_context>
chip_gen: v7x
topology: tpu7x:2x2x1
jax: 0.10.0
libtpu: 0.0.40
codegen_flags: <defaults>
</compile_context>

<pallas_src>
import functools

import jax
import jax.numpy as jnp
from jax.experimental import pallas as pl
from jax.experimental.pallas import tpu as pltpu

LANE = 128
_SMALL_PROBLEM_FLOPS = 1 << 23   # below this, fused XLA GEMM beats pallas_call overhead


def _round_up(x, m):
    return ((x + m - 1) // m) * m


def _cdiv(a, b):
    return (a + b - 1) // b


def _vmem_limit_bytes():
    """Chip-aware scoped-VMEM limit: ~3/4 of physical, clamped to [32 MiB, 96 MiB].
    v5e/v6e (128 MiB physical) -> 96 MiB; v7x (64 MiB) -> 48 MiB; unknown -> 48 MiB."""
    try:
        cap = int(pltpu.get_tpu_info().vmem_capacity_bytes)
    except Exception:
        cap = 64 * 1024 * 1024
    return max(32 * 1024 * 1024, min(3 * cap // 4, 96 * 1024 * 1024))


def _linear_kernel(x_ref, w_ref, b_ref, o_ref):
    # x_ref: (tm, tk)  w_ref: (tk, tn)  b_ref: (1, tn) f32  o_ref: (tm, tn) f32
    # o_ref's block index (i, j) is independent of the k grid axis, so the output
    # tile stays resident in VMEM across the whole reduction and doubles as the
    # f32 accumulator (no scratch buffer, no epilogue VMEM->VMEM copy).
    k = pl.program_id(2)

    @pl.when(k == 0)
    def _():
        o_ref[...] = jnp.broadcast_to(b_ref[...], o_ref.shape)

    o_ref[...] += jax.lax.dot_general(
        x_ref[...], w_ref[...],
        dimension_numbers=(((1,), (0,)), ((), ())),   # K-last LHS @ K-first RHS
        preferred_element_type=jnp.float32,
    )


def prepare_hashed_fc_params(weight, bias, *, compute_dtype=jnp.float32,
                             tk_max=512, tn_max=512):
    """One-time transform of PyTorch-layout params into the kernel layout.

    weight: (output_dim, input_dim) -> w_t: (K_pad, N_pad), transposed + zero-padded,
            stored in `compute_dtype` (pass jnp.bfloat16 for the fast path: half the
            weight HBM bytes, 2x MXU throughput; accumulation stays f32).
    bias:   (output_dim,)           -> b2:  (1, N_pad) float32.
    """
    O, K = weight.shape
    if K <= tk_max:
        K_pad = _round_up(K, LANE)        # lane-aligned K: unmasked x vld, aligned W sublanes
        tk = K_pad
    else:
        K_pad = _round_up(K, tk_max)
        tk = tk_max
    tn = min(tn_max, _round_up(O, LANE))  # widest lane-dense store without huge N padding
    N_pad = _round_up(O, tn)

    w_t = (jnp.zeros((K_pad, N_pad), compute_dtype)
           .at[:K, :O].set(weight.T.astype(compute_dtype)))
    b2 = jnp.zeros((1, N_pad), jnp.float32).at[0, :O].set(bias.astype(jnp.float32))
    meta = dict(K=K, O=O, tk=tk, tn=tn)
    return w_t, b2, meta


@functools.partial(jax.jit, static_argnames=("tk", "tn", "out_dim", "tm_max"))
def _hashed_fc_forward_impl(x, w_t, b2, *, tk, tn, out_dim, tm_max=512):
    M, K = x.shape
    K_pad, N_pad = w_t.shape
    compute_dtype = w_t.dtype
    x = x.astype(compute_dtype)

    # --- M tiling: pad only up to a multiple of the chosen tm (sublane-aligned:
    #     16 for bf16 packing, 8 for f32) -- no rounding M up to tm_max.
    sub = 16 if compute_dtype == jnp.bfloat16 else 8
    n_m_blocks = _cdiv(M, tm_max)
    tm = _round_up(_cdiv(M, n_m_blocks), sub)
    M_pad = tm * n_m_blocks

    if (M_pad, K_pad) != (M, K):
        x = jnp.pad(x, ((0, M_pad - M), (0, K_pad - K)))   # zero padding is exact

    # --- Ensure >= 2 blocks on a "parallel" axis when nearly free, so v7x's second
    #     TensorCore gets work (costs one extra ~0.35us grid step on 1-TC chips).
    if M_pad // tm == 1 and N_pad // tn == 1 and tn % 256 == 0:
        tn //= 2

    grid = (M_pad // tm, N_pad // tn, K_pad // tk)

    isz = jnp.dtype(compute_dtype).itemsize
    cost = pl.CostEstimate(
        flops=2 * M_pad * N_pad * K_pad,
        transcendentals=0,
        bytes_accessed=(isz * M_pad * K_pad * (N_pad // tn)      # x re-read per j block
                        + isz * K_pad * N_pad * (M_pad // tm)    # W re-read per i block
                        + 4 * N_pad + 4 * M_pad * N_pad),
    )

    y_pad = pl.pallas_call(
        _linear_kernel,
        out_shape=jax.ShapeDtypeStruct((M_pad, N_pad), jnp.float32),
        grid=grid,
        in_specs=[
            pl.BlockSpec((tm, tk), lambda i, j, k: (i, k)),
            pl.BlockSpec((tk, tn), lambda i, j, k: (k, j)),
            pl.BlockSpec((1, tn), lambda i, j, k: (0, j)),   # bias resident across i, k
        ],
        out_specs=pl.BlockSpec((tm, tn), lambda i, j, k: (i, j)),
        compiler_params=pltpu.CompilerParams(
            dimension_semantics=("parallel", "parallel", "arbitrary"),
            vmem_limit_bytes=_vmem_limit_bytes(),
        ),
        cost_estimate=cost,
    )(x, w_t, b2)

    return y_pad[:M, :out_dim]


def hashed_fc_forward(x, w_t, b2, meta, *, force_pallas=False):
    """Pallas implementation of HashedFC.forward (a plain Linear layer)."""
    M = x.shape[0]
    K, O = meta["K"], meta["O"]
    if not force_pallas and 2 * M * K * O < _SMALL_PROBLEM_FLOPS:
        # Tiny-problem bypass: pallas_call fixed cost dominates; XLA's fused GEMM wins.
        y = jnp.dot(x.astype(w_t.dtype), w_t[:K, :O],
                    preferred_element_type=jnp.float32)
        return y + b2[0, :O]
    return _hashed_fc_forward_impl(
        x, w_t, b2, tk=meta["tk"], tn=meta["tn"], out_dim=O)


def init_hashed_fc_params(key, input_dim, output_dim):
    """Deterministic init mirroring nn.Linear defaults (kaiming uniform, a=sqrt(5)):
    U(-1/sqrt(fan_in), 1/sqrt(fan_in)) for both weight and bias."""
    kw, kb = jax.random.split(key)
    bound = 1.0 / jnp.sqrt(jnp.float32(input_dim))
    weight = jax.random.uniform(
        kw, (output_dim, input_dim), jnp.float32, minval=-bound, maxval=bound)
    bias = jax.random.uniform(
        kb, (output_dim,), jnp.float32, minval=-bound, maxval=bound)
    return weight, bias


if __name__ == "__main__":
    key = jax.random.PRNGKey(0)
    k_x, k_p, k_x2, k_p2 = jax.random.split(key, 4)

    # --- Test A: toy HashedFC(32, 64) size, f32, forced through the Pallas path.
    batch, input_dim, output_dim = 8, 32, 64
    x = jax.random.normal(k_x, (batch, input_dim), dtype=jnp.float32)
    weight, bias = init_hashed_fc_params(k_p, input_dim, output_dim)
    w_t, b2, meta = prepare_hashed_fc_params(weight, bias, compute_dtype=jnp.float32)

    y = jax.block_until_ready(hashed_fc_forward(x, w_t, b2, meta, force_pallas=True))
    y_ref = x @ weight.T + bias
    assert y.shape == (batch, output_dim)
    assert jnp.allclose(y, y_ref, atol=1e-5, rtol=1e-5)

    # Default dispatch at this size takes the small-problem bypass; also exact in f32.
    y_bypass = jax.block_until_ready(hashed_fc_forward(x, w_t, b2, meta))
    assert jnp.allclose(y_bypass, y_ref, atol=1e-5, rtol=1e-5)

    # --- Test B: moderate size with bf16 weights (recommended fast path); exercises
    #     ragged M/K/N padding and a multi-step reduction axis (K_pad = 1024, tk = 512).
    M2, K2, O2 = 96, 640, 320
    x2 = jax.random.normal(k_x2, (M2, K2), dtype=jnp.float32)
    w2, bias2 = init_hashed_fc_params(k_p2, K2, O2)
    w2_t, b2_2, meta2 = prepare_hashed_fc_params(w2, bias2, compute_dtype=jnp.bfloat16)

    y2 = jax.block_until_ready(hashed_fc_forward(x2, w2_t, b2_2, meta2))
    y2_ref = x2 @ w2.T + bias2
    assert y2.shape == (M2, O2)
    assert jnp.allclose(y2, y2_ref, atol=3e-2, rtol=3e-2)   # bf16 inputs, f32 accumulate

    print("KERNEL_OK")
</pallas_src>

<mosaic_0001>
module attributes {stable_mosaic.version = 11 : i64} {
  func.func @_linear_kernel(%arg0: i32, %arg1: i32, %arg2: i32, %arg3: memref<8x128xf32, #tpu.memory_space<vmem>>, %arg4: memref<128x128xf32, #tpu.memory_space<vmem>>, %arg5: memref<1x128xf32, #tpu.memory_space<vmem>>, %arg6: memref<8x128xf32, #tpu.memory_space<vmem>>) attributes {dimension_semantics = [#tpu.dimension_semantics<parallel>, #tpu.dimension_semantics<parallel>, #tpu.dimension_semantics<arbitrary>], iteration_bounds = array<i64: 1, 1, 1>, scalar_prefetch = 0 : i64, scratch_operands = 0 : i64, tpu.core_type = #tpu.core_type<tc>, window_params = [{transform_indices = @transform_0, window_bounds = array<i64: 8, 128>}, {transform_indices = @transform_1, window_bounds = array<i64: 128, 128>}, {transform_indices = @transform_2, window_bounds = array<i64: 1, 128>}, {transform_indices = @transform_3, window_bounds = array<i64: 8, 128>}]} {
    %c0_i32 = arith.constant 0 : i32
    %0 = arith.cmpi eq, %arg2, %c0_i32 : i32
    %1 = arith.extui %0 : i1 to i32
    %c0_i32_0 = arith.constant 0 : i32
    %2 = arith.cmpi ne, %1, %c0_i32_0 : i32
    scf.if %2 {
      %c0_8 = arith.constant 0 : index
      %c0_9 = arith.constant 0 : index
      %9 = vector.load %arg5[%c0_8, %c0_9] : memref<1x128xf32, #tpu.memory_space<vmem>>, vector<1x128xf32>
      %10 = vector.shape_cast %9 : vector<1x128xf32> to vector<1x128xf32>
      %11 = vector.broadcast %10 : vector<1x128xf32> to vector<8x128xf32>
      %c0_10 = arith.constant 0 : index
      %c0_11 = arith.constant 0 : index
      %12 = vector.load %arg6[%c0_10, %c0_11] : memref<8x128xf32, #tpu.memory_space<vmem>>, vector<8x128xf32>
      tpu.vector_store %arg6[%c0_10, %c0_11], %11 {strides = array<i32>} : memref<8x128xf32, #tpu.memory_space<vmem>>, vector<8x128xf32>,
    } else {
    }
    %c0 = arith.constant 0 : index
    %c0_1 = arith.constant 0 : index
    %3 = vector.load %arg6[%c0, %c0_1] : memref<8x128xf32, #tpu.memory_space<vmem>>, vector<8x128xf32>
    %c0_2 = arith.constant 0 : index
    %c0_3 = arith.constant 0 : index
    %4 = vector.load %arg3[%c0_2, %c0_3] : memref<8x128xf32, #tpu.memory_space<vmem>>, vector<8x128xf32>
    %c0_4 = arith.constant 0 : index
    %c0_5 = arith.constant 0 : index
    %5 = vector.load %arg4[%c0_4, %c0_5] : memref<128x128xf32, #tpu.memory_space<vmem>>, vector<128x128xf32>
    %cst = arith.constant dense<0.000000e+00> : vector<8x128xf32>
    %6 = tpu.matmul %4, %5, %cst {dimension_numbers = #tpu.dot_dimension_numbers<[1], [0], [0], [1], [0, 0, 1, 1], [], []>} : vector<8x128xf32>, vector<128x128xf32>, vector<8x128xf32> -> vector<8x128xf32>
    %7 = arith.addf %3, %6 : vector<8x128xf32>
    %c0_6 = arith.constant 0 : index
    %c0_7 = arith.constant 0 : index
    %8 = vector.load %arg6[%c0_6, %c0_7] : memref<8x128xf32, #tpu.memory_space<vmem>>, vector<8x128xf32>
    tpu.vector_store %arg6[%c0_6, %c0_7], %7 {strides = array<i32>} : memref<8x128xf32, #tpu.memory_space<vmem>>, vector<8x128xf32>,
    return
  }
  func.func @transform_0(%arg0: i32, %arg1: i32, %arg2: i32) -> (i32, i32) {
    %c0_i32 = arith.constant 0 : i32
    return %arg0, %arg2 : i32, i32
  }
  func.func @transform_1(%arg0: i32, %arg1: i32, %arg2: i32) -> (i32, i32) {
    %c0_i32 = arith.constant 0 : i32
    return %arg2, %arg1 : i32, i32
  }
  func.func @transform_2(%arg0: i32, %arg1: i32, %arg2: i32) -> (i32, i32) {
    %c0_i32 = arith.constant 0 : i32
    %c0_i32_0 = arith.constant 0 : i32
    return %c0_i32, %arg1 : i32, i32
  }
  func.func @transform_3(%arg0: i32, %arg1: i32, %arg2: i32) -> (i32, i32) {
    %c0_i32 = arith.constant 0 : i32
    return %arg0, %arg1 : i32, i32
  }
}

</mosaic_0001>

<bundles_post_ra>
// kernel: _hashed_fc_forward_impl.1
= control target key start
LH: loop header
LB: loop body
LE: loop exit
PB: predicated region body
PF: predicated region fallthrough
CT: control target
= control target key end

     0   :  { %8 = vsyncpa [#allocation3], 0  ;;  %s335_s0 = inlined_call_operand.vmem [shape: f32[8,128], index: 0, kind: input, shape index: {}]   ;;  %s336_s1 = inlined_call_operand.hbm [shape: f32[128,128], index: 1, kind: input, shape index: {}]   ;;  %s337_s2 = inlined_call_operand.vmem [shape: f32[1,128], index: 2, kind: input, shape index: {}]   ;;  %s338_s3 = inlined_call_operand.hbm [shape: f32[8,128], index: 3, kind: output, shape index: {}]  }
   0x1   :  { %9 = vsyncpa [#allocation4], 0  ;;  %s278_s12 = smov [#allocation2]   ;;  %s230_s16 = scalar_lea.hbm %s336_s1, 2048 }
   0x2   :  { %s17_s13 = sshll.u32 %s278_s12, 4  ;;  %p231_p0 = scmp.ne.s32.totalorder %s336_s1, %s230_s16  ;;  %s18_s13 = int_to_ptr.vmem [resolvable:$true] %s17_s13 }
   0x3   :  { %p234_p1 = scmp.lt.u32.totalorder %s230_s16, %s336_s1 }
   0x5   :  { %p236_p2 = pnand %p234_p1, %p231_p0 }
   0x7   :  { %239 = shalt.err (!%p236_p2)
}
   0x8   :  { %s240_s21 = scalar_lea.vmem %s18_s13, 2048  ;;  %p245_p4 = scmp.lt.s32.totalorder %s18_s13, %s18_s13 }
   0x9   :  { %p241_p3 = scmp.ne.s32.totalorder %s18_s13, %s240_s21  ;;  %p246_p5 = scmp.lt.s32.totalorder %s240_s21, %s240_s21 }
   0xb   :  { %p247_p6 = por %p246_p5, %p245_p4 }
   0xd   :  { %p248_p7 = pnand %p247_p6, %p241_p3 }
   0xf   :  { %251 = shalt.err (!%p248_p7)
}
  0x10   :  { %s279_s22 = smov 128   ;;  %s280_s23 = smov 8  }
  0x11   :  { %23 = dma.hbm_to_vmem [thread:$0]  %s336_s1, 2048, %s18_s13, [#allocation3], %s279_s22, %s279_s22, %s280_s23  }
  0x12   :  { %274 = dma.done.wait [#allocation3], 2048  }
  0x13   :  { %275 = vsyncadd [#allocation3], 4294965248  ;;  %v281_v0 = vmov 0.0|0.0   ;;  %vm282_vm0 = vmmov 0   ;;  %v283_v1 = vmov 0.0   ;;  %v43_v2 = vld [vmem:[#allocation2] sm:$0xff] }
  0x14   :  { %199 = vmatprep.subr.bf16.mxu0 %v281_v0  ;;  %196 = vmatprep.mubr.msk.f32.mxu0 %vm282_vm0, %v283_v1  ;;  %v44_v3 = vld [vmem:[#allocation2 + $0x8] sm:$0xff]  ;;  %v45_v4 = vld [vmem:[#allocation2 + $0x10] sm:$0xff]  ;;  %v46_v6 = vld [vmem:[#allocation2 + $0x18] sm:$0xff]  ;;  %s284_s29 = smov [#allocation5]  }
  0x15   :  { %v200_v5 = vpack.c.bf16 %v44_v3, %v43_v2  ;;  %v203_v7 = vpack.c.bf16 %v46_v6, %v45_v4  ;;  %v47_v8 = vld [vmem:[#allocation2 + $0x20] sm:$0xff]  ;;  %v48_v9 = vld [vmem:[#allocation2 + $0x28] sm:$0xff]  ;;  %v49_v11 = vld [vmem:[#allocation2 + $0x30] sm:$0xff]  ;;  %s137_s30 = sshll.u32 %s284_s29, 4  ;;  %s138_s30 = int_to_ptr.vmem [resolvable:$true] %s137_s30 }
  0x16   :  { %v206_v10 = vpack.c.bf16 %v48_v9, %v47_v8  ;;  %v50_v12 = vld [vmem:[#allocation2 + $0x38] sm:$0xff]  ;;  %v51_v14 = vld [vmem:[#allocation2 + $0x40] sm:$0xff]  ;;  %v52_v15 = vld [vmem:[#allocation2 + $0x48] sm:$0xff]  ;;  %s252_s4 = scalar_lea.vmem %s138_s30, 128  ;;  %p257_p9 = scmp.lt.s32.totalorder %s138_s30, %s138_s30 }
  0x17   :  { %201 = vmatpush3.bf16.msra.mxu0 %v200_v5  ;;  %v209_v13 = vpack.c.bf16 %v50_v12, %v49_v11  ;;  %v212_v16 = vpack.c.bf16 %v52_v15, %v51_v14  ;;  %v53_v17 = vld [vmem:[#allocation2 + $0x50] sm:$0xff]  ;;  %v54_v18 = vld [vmem:[#allocation2 + $0x58] sm:$0xff]  ;;  %v55_v20 = vld [vmem:[#allocation2 + $0x60] sm:$0xff]  ;;  %p253_p8 = scmp.ne.s32.totalorder %s138_s30, %s252_s4  ;;  %p258_p10 = scmp.lt.s32.totalorder %s252_s4, %s252_s4 }
  0x18   :  { %202 = vmatprep.subr.bf16.mxu0 %v281_v0  ;;  %v215_v19 = vpack.c.bf16 %v54_v18, %v53_v17  ;;  %v56_v21 = vld [vmem:[#allocation2 + $0x68] sm:$0xff]  ;;  %v57_v23 = vld [vmem:[#allocation2 + $0x70] sm:$0xff]  ;;  %v58_v24 = vld [vmem:[#allocation2 + $0x78] sm:$0xff] }
  0x19   :  { %v218_v22 = vpack.c.bf16 %v56_v21, %v55_v20  ;;  %v221_v25 = vpack.c.bf16 %v58_v24, %v57_v23  ;;  %v42_v26 = vld [vmem:[%s335_s0] sm:$0xff]  ;;  %p259_p11 = por %p258_p10, %p257_p9 }
  0x1a   :  { %v146_v27 = vld [vmem:[%s337_s2] ss:$0 sm:$0xff] }
  0x1b   :  { %204 = vmatpush3.bf16.msra.mxu0 %v203_v7  ;;  %p260_p12 = pnand %p259_p11, %p253_p8 }
  0x1c   :  { %205 = vmatprep.subr.bf16.mxu0 %v281_v0 }
  0x1f   :  { %207 = vmatpush3.bf16.msra.mxu0 %v206_v10 }
  0x20   :  { %208 = vmatprep.subr.bf16.mxu0 %v281_v0 }
  0x23   :  { %210 = vmatpush3.bf16.msra.mxu0 %v209_v13 }
  0x24   :  { %211 = vmatprep.subr.bf16.mxu0 %v281_v0 }
  0x27   :  { %213 = vmatpush3.bf16.msra.mxu0 %v212_v16 }
  0x28   :  { %214 = vmatprep.subr.bf16.mxu0 %v281_v0 }
  0x2b   :  { %216 = vmatpush3.bf16.msra.mxu0 %v215_v19 }
  0x2c   :  { %217 = vmatprep.subr.bf16.mxu0 %v281_v0 }
  0x2f   :  { %219 = vmatpush3.bf16.msra.mxu0 %v218_v22 }
  0x30   :  { %220 = vmatprep.subr.bf16.mxu0 %v281_v0 }
  0x33   :  { %222 = vmatpush3.bf16.msra.mxu0 %v221_v25 }
  0x36   :  { %197 = vmatmul.mubr.f32.vlgmr.msra.gmra.mrb[0].mxu0 %v42_v26 }
 0x109   :  { %v125_v28 = vpop.f32.mrb[0].mxu0 }
 0x10a   :  { %v129_v29 = vadd.f32 %v146_v27, %v125_v28  ;;  %v198_v30 = vpop.f32.mrb[1].mxu0 }
 0x10c   :  { %130 = vst [vmem:[#allocation5] sm:$0xff] %v129_v29 }
 0x10d   :  { %263 = shalt.err (!%p260_p12)
}
 0x10e   :  { %s264_s6 = scalar_lea.hbm %s338_s3, 128 }
 0x10f   :  { %p265_p13 = scmp.ne.s32.totalorder %s338_s3, %s264_s6  ;;  %p268_p0 = scmp.lt.u32.totalorder %s264_s6, %s338_s3 }
 0x111   :  { %p270_p1 = pnand %p268_p0, %p265_p13 }
 0x113   :  { %273 = shalt.err (!%p270_p1)
}
 0x114   :  { %140 = dma.vmem_to_hbm [thread:$0]  %s138_s30, 128, %s338_s3, [#allocation4]  }
 0x115   :  { %276 = dma.done.wait [#allocation4], 128  }
 0x116   :  { %277 = vsyncadd [#allocation4], 4294967168 }
 0x117   :  { %144 = vsyncpa [#allocation3], 1 }
 0x118   :  { %145 = vsyncpa [#allocation4], 1 }

</bundles_post_ra>
